<compile_context>
chip_gen: v5e
topology: v5e:2x2
jax: 0.10.0
libtpu: 0.0.40
codegen_flags: <defaults>
</compile_context>

<pallas_src>
import jax
import jax.numpy as jnp
from jax.experimental import pallas as pl
from jax.experimental.pallas import tpu as pltpu

_SUBLANE = 8        # f32 vreg sublane rows (second-to-last dim granularity)
_MAX_TILE_B = 1024  # batch rows per grid step (review: 512-1024 ~ HBM roofline)


def _round_up(n: int, m: int) -> int:
    return ((n + m - 1) // m) * m


def _pick_tile_b(B: int) -> int:
    """Batch tile: as large as sensible (fewer per-step overheads), a multiple
    of 8 rows, and >=2 grid blocks whenever B > 8 so v7x's two TensorCores both
    get work (harmless on v5e/v6e)."""
    if B <= _SUBLANE:
        return B                                   # single full-extent block
    half = _round_up(-(-B // 2), _SUBLANE)         # ceil(B/2) rounded to sublane
    return min(_MAX_TILE_B, half)


def mlp_kernel(x_ref, w1_ref, b1_ref, w2_ref, b2_ref, o_ref):
    # Layer 1: Linear (MXU, f32 accumulation) + bias + ReLU (VPU, f32).
    h = jnp.dot(x_ref[...], w1_ref[...], preferred_element_type=jnp.float32)
    h = jnp.maximum(h + b1_ref[...], 0.0)          # b1 is [1, H], broadcast

    # Layer 2: Linear + bias + ReLU.  Cast activations to the weight dtype so
    # the bf16 path (v6e/v7x) feeds the MXU natively; accumulation stays f32
    # and the f32 epilogue stays on the VPU (right placement for v5e too).
    y = jnp.dot(h.astype(w2_ref.dtype), w2_ref[...],
                preferred_element_type=jnp.float32)
    y = jnp.maximum(y + b2_ref[...], 0.0)          # b2 is [1, N], broadcast

    o_ref[...] = y.astype(o_ref.dtype)


def prepare_params(w1, b1, w2, b2, *, matmul_dtype=None):
    """One-time parameter preparation, hoisted out of the per-call path.

    w1: [input_size, hidden_size],  b1: [hidden_size]
    w2: [hidden_size, output_size], b2: [output_size]
    matmul_dtype: optional dtype (e.g. jnp.bfloat16 on v6e/v7x) for the matmul
                  inputs; accumulation / bias / ReLU remain f32.
    """
    w1p = w1 if matmul_dtype is None else w1.astype(matmul_dtype)
    w2p = w2 if matmul_dtype is None else w2.astype(matmul_dtype)
    b1p = b1.astype(jnp.float32).reshape(1, -1)    # [1, H]
    b2p = b2.astype(jnp.float32).reshape(1, -1)    # [1, N]
    return (w1p, b1p, w2p, b2p)


@jax.jit
def my_first_network(x, params):
    """Forward pass of MyFirstNetwork.

    x: [B, input_size]; params from prepare_params(). Returns [B, output_size].
    """
    w1p, b1p, w2p, b2p = params
    B, K = x.shape
    H = w1p.shape[1]
    N = w2p.shape[1]
    out_dtype = x.dtype

    tile_b = _pick_tile_b(B)
    grid_b = pl.cdiv(B, tile_b)   # no batch padding; trailing partial block is
                                  # masked on writeback by the pipeline.

    # Only x is cast (no-op for the default f32 path); everything else was
    # prepared once.
    x_mm = x.astype(w1p.dtype)

    return pl.pallas_call(
        mlp_kernel,
        out_shape=jax.ShapeDtypeStruct((B, N), out_dtype),
        grid_spec=pltpu.PrefetchScalarGridSpec(
            num_scalar_prefetch=0,
            grid=(grid_b,),
            in_specs=[
                # x: one batch tile per grid step (auto double-buffered),
                # full-extent K (no HBM padding of the input stream).
                pl.BlockSpec((tile_b, K), lambda i: (i, 0)),
                # Weights / biases: constant index_map -> VMEM-resident,
                # zero per-step DMA.
                pl.BlockSpec((K, H), lambda i: (0, 0)),
                pl.BlockSpec((1, H), lambda i: (0, 0)),
                pl.BlockSpec((H, N), lambda i: (0, 0)),
                pl.BlockSpec((1, N), lambda i: (0, 0)),
            ],
            # Full-extent N output block: minimal HBM write bytes (the kernel
            # is bandwidth-bound, so byte count beats the unmasked-vst effect).
            out_specs=pl.BlockSpec((tile_b, N), lambda i: (i, 0)),
        ),
        compiler_params=pltpu.CompilerParams(
            # Batch blocks are independent -> shard across v7x's two
            # TensorCores; harmless on v5e/v6e.
            dimension_semantics=("parallel",),
        ),
    )(x_mm, w1p, b1p, w2p, b2p)


if __name__ == "__main__":
    # Small shapes consistent with the module's forward.
    batch, input_size, hidden_size, output_size = 8, 32, 64, 16

    key = jax.random.PRNGKey(0)
    kx, kw1, kb1, kw2, kb2 = jax.random.split(key, 5)

    # Deterministic parameter init (PyTorch nn.Linear-like uniform bounds).
    bound1 = 1.0 / (input_size ** 0.5)
    bound2 = 1.0 / (hidden_size ** 0.5)
    x = jax.random.normal(kx, (batch, input_size), dtype=jnp.float32)
    w1 = jax.random.uniform(kw1, (input_size, hidden_size), jnp.float32, -bound1, bound1)
    b1 = jax.random.uniform(kb1, (hidden_size,), jnp.float32, -bound1, bound1)
    w2 = jax.random.uniform(kw2, (hidden_size, output_size), jnp.float32, -bound2, bound2)
    b2 = jax.random.uniform(kb2, (output_size,), jnp.float32, -bound2, bound2)

    # Pure-JAX reference of the same forward semantics.
    ref = jnp.maximum(jnp.maximum(x @ w1 + b1, 0.0) @ w2 + b2, 0.0)

    # --- Default f32 path: exact vs. reference. ---
    params_f32 = prepare_params(w1, b1, w2, b2)
    out = jax.block_until_ready(my_first_network(x, params_f32))
    assert out.shape == (batch, output_size)
    assert jnp.allclose(out, ref, atol=1e-5, rtol=1e-5)

    # --- bf16 matmul-input path (v6e/v7x fast path); f32 accumulation. ---
    params_bf16 = prepare_params(w1, b1, w2, b2, matmul_dtype=jnp.bfloat16)
    out_bf16 = jax.block_until_ready(my_first_network(x, params_bf16))
    assert out_bf16.shape == (batch, output_size)
    assert jnp.allclose(out_bf16, ref, atol=5e-2, rtol=5e-2)

    print("KERNEL_OK")
</pallas_src>

<mosaic_0001>
module attributes {stable_mosaic.version = 11 : i64} {
  func.func @mlp_kernel(%arg0: i32, %arg1: memref<8x32xf32, #tpu.memory_space<vmem>>, %arg2: memref<32x64xf32, #tpu.memory_space<vmem>>, %arg3: memref<1x64xf32, #tpu.memory_space<vmem>>, %arg4: memref<64x16xf32, #tpu.memory_space<vmem>>, %arg5: memref<1x16xf32, #tpu.memory_space<vmem>>, %arg6: memref<8x16xf32, #tpu.memory_space<vmem>>) attributes {dimension_semantics = [#tpu.dimension_semantics<parallel>], iteration_bounds = array<i64: 1>, scalar_prefetch = 0 : i64, scratch_operands = 0 : i64, tpu.core_type = #tpu.core_type<tc>, window_params = [{transform_indices = @transform_0, window_bounds = array<i64: 8, 32>}, {pipeline_mode = #tpu.pipeline_mode<synchronous>, transform_indices = @transform_1, window_bounds = array<i64: 32, 64>}, {pipeline_mode = #tpu.pipeline_mode<synchronous>, transform_indices = @transform_2, window_bounds = array<i64: 1, 64>}, {pipeline_mode = #tpu.pipeline_mode<synchronous>, transform_indices = @transform_3, window_bounds = array<i64: 64, 16>}, {pipeline_mode = #tpu.pipeline_mode<synchronous>, transform_indices = @transform_4, window_bounds = array<i64: 1, 16>}, {transform_indices = @transform_5, window_bounds = array<i64: 8, 16>}]} {
    %c0 = arith.constant 0 : index
    %c0_0 = arith.constant 0 : index
    %0 = vector.load %arg1[%c0, %c0_0] : memref<8x32xf32, #tpu.memory_space<vmem>>, vector<8x32xf32>
    %c0_1 = arith.constant 0 : index
    %c0_2 = arith.constant 0 : index
    %1 = vector.load %arg2[%c0_1, %c0_2] : memref<32x64xf32, #tpu.memory_space<vmem>>, vector<32x64xf32>
    %cst = arith.constant dense<0.000000e+00> : vector<8x64xf32>
    %2 = tpu.matmul %0, %1, %cst {dimension_numbers = #tpu.dot_dimension_numbers<[1], [0], [0], [1], [0, 0, 1, 1], [], []>} : vector<8x32xf32>, vector<32x64xf32>, vector<8x64xf32> -> vector<8x64xf32>
    %c0_3 = arith.constant 0 : index
    %c0_4 = arith.constant 0 : index
    %3 = vector.load %arg3[%c0_3, %c0_4] : memref<1x64xf32, #tpu.memory_space<vmem>>, vector<1x64xf32>
    %4 = vector.broadcast %3 : vector<1x64xf32> to vector<8x64xf32>
    %5 = arith.addf %2, %4 : vector<8x64xf32>
    %cst_5 = arith.constant 0.000000e+00 : f32
    %6 = vector.broadcast %cst_5 : f32 to vector<8x64xf32>
    %7 = arith.maximumf %5, %6 : vector<8x64xf32>
    %c0_6 = arith.constant 0 : index
    %c0_7 = arith.constant 0 : index
    %8 = vector.load %arg4[%c0_6, %c0_7] : memref<64x16xf32, #tpu.memory_space<vmem>>, vector<64x16xf32>
    %cst_8 = arith.constant dense<0.000000e+00> : vector<8x16xf32>
    %9 = tpu.matmul %7, %8, %cst_8 {dimension_numbers = #tpu.dot_dimension_numbers<[1], [0], [0], [1], [0, 0, 1, 1], [], []>} : vector<8x64xf32>, vector<64x16xf32>, vector<8x16xf32> -> vector<8x16xf32>
    %c0_9 = arith.constant 0 : index
    %c0_10 = arith.constant 0 : index
    %10 = vector.load %arg5[%c0_9, %c0_10] : memref<1x16xf32, #tpu.memory_space<vmem>>, vector<1x16xf32>
    %11 = vector.broadcast %10 : vector<1x16xf32> to vector<8x16xf32>
    %12 = arith.addf %9, %11 : vector<8x16xf32>
    %cst_11 = arith.constant 0.000000e+00 : f32
    %13 = vector.broadcast %cst_11 : f32 to vector<8x16xf32>
    %14 = arith.maximumf %12, %13 : vector<8x16xf32>
    %c0_12 = arith.constant 0 : index
    %c0_13 = arith.constant 0 : index
    %15 = vector.load %arg6[%c0_12, %c0_13] : memref<8x16xf32, #tpu.memory_space<vmem>>, vector<8x16xf32>
    tpu.vector_store %arg6[%c0_12, %c0_13], %14 {strides = array<i32>} : memref<8x16xf32, #tpu.memory_space<vmem>>, vector<8x16xf32>,
    return
  }
  func.func @transform_0(%arg0: i32) -> (i32, i32) {
    %c0_i32 = arith.constant 0 : i32
    %c0_i32_0 = arith.constant 0 : i32
    return %arg0, %c0_i32 : i32, i32
  }
  func.func @transform_1(%arg0: i32) -> (i32, i32) {
    %c0_i32 = arith.constant 0 : i32
    %c0_i32_0 = arith.constant 0 : i32
    %c0_i32_1 = arith.constant 0 : i32
    return %c0_i32, %c0_i32_0 : i32, i32
  }
  func.func @transform_2(%arg0: i32) -> (i32, i32) {
    %c0_i32 = arith.constant 0 : i32
    %c0_i32_0 = arith.constant 0 : i32
    %c0_i32_1 = arith.constant 0 : i32
    return %c0_i32, %c0_i32_0 : i32, i32
  }
  func.func @transform_3(%arg0: i32) -> (i32, i32) {
    %c0_i32 = arith.constant 0 : i32
    %c0_i32_0 = arith.constant 0 : i32
    %c0_i32_1 = arith.constant 0 : i32
    return %c0_i32, %c0_i32_0 : i32, i32
  }
  func.func @transform_4(%arg0: i32) -> (i32, i32) {
    %c0_i32 = arith.constant 0 : i32
    %c0_i32_0 = arith.constant 0 : i32
    %c0_i32_1 = arith.constant 0 : i32
    return %c0_i32, %c0_i32_0 : i32, i32
  }
  func.func @transform_5(%arg0: i32) -> (i32, i32) {
    %c0_i32 = arith.constant 0 : i32
    %c0_i32_0 = arith.constant 0 : i32
    return %arg0, %c0_i32 : i32, i32
  }
}

</mosaic_0001>

<bundles_post_ra>
// kernel: my_first_network.1
= control target key start
LH: loop header
LB: loop body
LE: loop exit
PB: predicated region body
PF: predicated region fallthrough
CT: control target
= control target key end

     0   :  { %s220_s0 = inlined_call_operand.vmem [shape: f32[8,32], index: 0, kind: input, shape index: {}]   ;;  %s221_s1 = inlined_call_operand.vmem [shape: f32[32,64], index: 1, kind: input, shape index: {}]   ;;  %s222_s2 = inlined_call_operand.vmem [shape: f32[1,64], index: 2, kind: input, shape index: {}]   ;;  %s223_s3 = inlined_call_operand.vmem [shape: f32[64,16], index: 3, kind: input, shape index: {}]   ;;  %s224_s4 = inlined_call_operand.vmem [shape: f32[1,16], index: 4, kind: input, shape index: {}]   ;;  %s225_s5 = inlined_call_operand.hbm [shape: f32[8,16], index: 5, kind: output, shape index: {}]  }
   0x1   :  { %v25_v0 = vld [vmem:[%s221_s1 + $0x18] sm:$0xff]  ;;  %v24_v1 = vld [vmem:[%s221_s1 + $0x10] sm:$0xff]  ;;  %v23_v3 = vld [vmem:[%s221_s1 + $0x8] sm:$0xff] }
   0x2   :  { %46 = vmatpush.msra.mxu0 %v25_v0  ;;  %v62_v2 = vld [vmem:[%s223_s3 + $0x38] sm:$0xff]  ;;  %v61_v4 = vld [vmem:[%s223_s3 + $0x30] sm:$0xff]  ;;  %v60_v5 = vld [vmem:[%s223_s3 + $0x28] sm:$0xff] }
   0x3   :  { %79 = vmatpush.msra.mxu1 %v62_v2  ;;  %v22_v6 = vld [vmem:[%s221_s1] sm:$0xff] }
   0x4   :  { %47 = vmatpush.msra.mxu0 %v24_v1 }
   0x5   :  { %80 = vmatpush.msra.mxu1 %v61_v4 }
   0x6   :  { %10 = vsyncpa [#allocation3], 0  ;;  %48 = vmatpush.msra.mxu0 %v23_v3  ;;  %v21_v7 = vld [vmem:[%s220_s0] sm:$0xff]  ;;  %vm30_vm0 = vcmask 261120   ;;  %v58_v9 = vld [vmem:[%s223_s3 + $0x18] sm:$0xff]  ;;  %vm67_vm1 = vcmask 523264  }
   0x7   :  { %v59_v8 = vld [vmem:[%s223_s3 + $0x20] sm:$0xff]  ;;  %81 = vmatpush.msra.mxu1 %v60_v5  ;;  %v57_v10 = vld [vmem:[%s223_s3 + $0x10] sm:$0xff]  ;;  %v56_v11 = vld [vmem:[%s223_s3 + $0x8] sm:$0xff]  ;;  %s141_s21 = smov [#allocation2]   ;;  %vm92_vm2 = vcmask 130048  }
   0x8   :  { %49 = vmatpush.msra.mxu0 %v22_v6  ;;  %v55_v12 = vld [vmem:[%s223_s3] sm:$0xff]  ;;  %s99_s22 = sshll.u32 %s141_s21, 4  ;;  %s101_s3 = sshll.u32 %s225_s5, 4  ;;  %s100_s22 = int_to_ptr.vmem [resolvable:$true] %s99_s22  ;;  %s102_s3 = int_to_ptr.hbm [resolvable:$true] %s101_s3 }
   0x9   :  { %110 = vmatmul.msk.f32.vlgmr.msra.gmra.mxu0 %vm30_vm0, %v21_v7  ;;  %82 = vmatpush.msra.mxu1 %v59_v8  ;;  %v113_v13 = vld [vmem:[%s222_s2] ss:$0 sm:$0xff] }
   0xa   :  { %v114_v17 = vld [vmem:[%s224_s4] ss:$0 sm:$0xff] }
   0xb   :  { %83 = vmatpush.msra.mxu1 %v58_v9 }
   0xd   :  { %84 = vmatpush.msra.mxu1 %v57_v10 }
   0xf   :  { %85 = vmatpush.msra.mxu1 %v56_v11 }
  0x11   :  { %86 = vmatpush.msra.mxu1 %v55_v12 }
  0x86   :  { %v51_v14 = vpop.f32.mrf.mxu0 }
  0x87   :  { %v52_v15 = vadd.f32 %v113_v13, %v51_v14 }
  0x89   :  { %v54_v16 = vmax.f32 %v52_v15, 0.0 }
  0x8b   :  { %111 = vmatmul.msk.f32.vlgmr.msra.gmra.mxu1 %vm67_vm1, %v54_v16 }
 0x108   :  { %v88_v18 = vpop.f32.mrf.mxu1 }
 0x109   :  { %v89_v19 = vadd.f32 %v114_v17, %v88_v18 }
 0x10b   :  { %v91_v20 = vmax.f32 %v89_v19, 0.0 }
 0x10d   :  { %93 = vst.msk [vmem:[#allocation2] sm:$0xff] %vm92_vm2, %v91_v20 }
 0x10e   :  { %104 = dma.vmem_to_hbm [thread:$0]  %s100_s22, 128, %s102_s3, [#allocation3]  }
 0x10f   :  { %139 = dma.done.wait [#allocation3], 128  }
 0x110   :  { %140 = vsyncadd [#allocation3], 4294967168 }
 0x111   :  { %109 = vsyncpa [#allocation3], 1 }

</bundles_post_ra>
